<compile_context>
chip_gen: v5e
topology: v5e:2x2
jax: 0.10.0
libtpu: 0.0.40
codegen_flags: <defaults>
</compile_context>

<pallas_src>
import jax
import jax.numpy as jnp
from jax.experimental import pallas as pl
from jax.experimental.pallas import tpu as pltpu


def _round_up(x, m):
    return ((x + m - 1) // m) * m


def _default_num_splits():
    # Only v7x has two TensorCores per chip worth splitting the batch over.
    try:
        kind = jax.devices()[0].device_kind.lower()
    except Exception:
        return 1
    return 2 if "v7" in kind else 1


def _make_club_kernel(hidden_pad, d_pad):
    """Kernel closure over static (padded) layer sizes."""

    def kernel(x_ref, y_ref, w1_ref, b1_ref, w2m_ref, b2m_ref, w2v_ref, b2v_ref,
               acc_ref):
        @pl.when(pl.program_id(1) == 0)
        def _init():
            acc_ref[...] = jnp.zeros_like(acc_ref)

        x = x_ref[...]                                   # [tile, Dp] bf16 (MXU)
        y = y_ref[...]                                   # [tile, Dp] f32 (VPU)

        # ---- fused layer-1: single [Dp, 2*Hp] bf16 matmul --------------------
        h = jnp.dot(x, w1_ref[...], preferred_element_type=jnp.float32)
        h = jnp.maximum(h + b1_ref[...], 0.0).astype(jnp.bfloat16)
        h_mu = h[:, :hidden_pad]          # lane-aligned slices (Hp % 128 == 0)
        h_lv = h[:, hidden_pad:]

        # ---- layer-2 heads ----------------------------------------------------
        mu = jnp.dot(h_mu, w2m_ref[...], preferred_element_type=jnp.float32) \
            + b2m_ref[...]
        logvar = jnp.tanh(
            jnp.dot(h_lv, w2v_ref[...], preferred_element_type=jnp.float32)
            + b2v_ref[...])

        # ---- minimal elementwise tail (VALU-bound on v6e/v7x) ------------------
        inv_var = jnp.exp(-logvar)                       # EUP
        ivmu = inv_var * mu
        diff = mu - y
        dv = diff * diff * inv_var                       # (mu - y)^2 / exp(logvar)

        part = jnp.concatenate(
            [
                jnp.sum(inv_var, axis=0, keepdims=True),     # A  = sum inv_var
                jnp.sum(ivmu, axis=0, keepdims=True),        # B  = sum inv_var*mu
                jnp.sum(ivmu * mu, axis=0, keepdims=True),   # Q  = sum inv_var*mu^2
                jnp.sum(dv, axis=0, keepdims=True),          # DV = sum diff^2*inv_var
                jnp.sum(logvar, axis=0, keepdims=True),      # LV = sum logvar
                jnp.zeros((3, d_pad), jnp.float32),          # pad to 8 sublanes
            ],
            axis=0,
        )
        acc_ref[...] += part

    return kernel


def club_forward(x, y, params, *, tile_n=None, num_splits=None):
    """CLUB forward pass. Returns (lld, upper_bound) f32 scalars."""
    (w1m, b1m, w2m, b2m, w1v, b1v, w2v, b2v) = params
    n, d = x.shape
    hidden = w1m.shape[1]

    d_pad = _round_up(d, 128)
    h_pad = _round_up(hidden, 128)
    pad_d = d_pad - d
    pad_h = h_pad - hidden

    # ---- pack / cast / zero-pad parameters (bf16 weights, f32 biases) ----------
    w1 = jnp.concatenate(
        [jnp.pad(w1m, ((0, pad_d), (0, pad_h))),
         jnp.pad(w1v, ((0, pad_d), (0, pad_h)))], axis=1).astype(jnp.bfloat16)
    b1 = jnp.concatenate(
        [jnp.pad(b1m, ((0, 0), (0, pad_h))),
         jnp.pad(b1v, ((0, 0), (0, pad_h)))], axis=1).astype(jnp.float32)
    w2m_b = jnp.pad(w2m, ((0, pad_h), (0, pad_d))).astype(jnp.bfloat16)
    w2v_b = jnp.pad(w2v, ((0, pad_h), (0, pad_d))).astype(jnp.bfloat16)
    b2m_f = jnp.pad(b2m, ((0, 0), (0, pad_d))).astype(jnp.float32)
    b2v_f = jnp.pad(b2v, ((0, 0), (0, pad_d))).astype(jnp.float32)

    # ---- batch tiling ----------------------------------------------------------
    if num_splits is None:
        num_splits = _default_num_splits()
    num_splits = max(1, int(num_splits))
    if tile_n is None:
        # Per-row footprint: x (bf16, 2 bufs) + y (f32, 2 bufs) + ~10 f32 [tile, Dp]
        # temporaries + h ([tile, 2*Hp], f32 + bf16).  ~24 MiB budget keeps the
        # whole step well under v7x's 64 MiB VMEM.
        per_row = d_pad * (2 * 2 + 4 * 2 + 10 * 4) + 2 * h_pad * 6
        tile_n = max(64, min(2048, (24 * 1024 * 1024) // per_row))
    rows_per_split = _round_up(pl.cdiv(n, num_splits), 8)
    tile = max(8, min(_round_up(int(tile_n), 8), rows_per_split))
    tiles_per_split = pl.cdiv(rows_per_split, tile)
    padded_n = num_splits * tiles_per_split * tile
    pad_rows = padded_n - n

    xb = jnp.pad(x.astype(jnp.bfloat16), ((0, pad_rows), (0, pad_d)))
    yf = y.astype(jnp.float32)
    yp = jnp.pad(yf, ((0, pad_rows), (0, pad_d)))

    kernel = _make_club_kernel(h_pad, d_pad)
    row_map = lambda s, t: (s * tiles_per_split + t, 0)
    const_map = lambda s, t: (0, 0)

    cost = pl.CostEstimate(
        flops=8 * padded_n * h_pad * d_pad,
        transcendentals=2 * padded_n * d_pad,
        bytes_accessed=(padded_n * d_pad * (2 + 4)            # x bf16, y f32
                        + 4 * d_pad * h_pad * 2                # weights (bf16)
                        + num_splits * 8 * d_pad * 4),         # partial outputs
    )

    acc = pl.pallas_call(
        kernel,
        out_shape=jax.ShapeDtypeStruct((num_splits * 8, d_pad), jnp.float32),
        grid_spec=pltpu.PrefetchScalarGridSpec(
            num_scalar_prefetch=0,
            grid=(num_splits, tiles_per_split),
            in_specs=[
                pl.BlockSpec((tile, d_pad), row_map),            # x tile (bf16)
                pl.BlockSpec((tile, d_pad), row_map),            # y tile (f32)
                pl.BlockSpec((d_pad, 2 * h_pad), const_map),     # fused w1
                pl.BlockSpec((1, 2 * h_pad), const_map),         # fused b1
                pl.BlockSpec((h_pad, d_pad), const_map),         # w2 (mu head)
                pl.BlockSpec((1, d_pad), const_map),             # b2 (mu head)
                pl.BlockSpec((h_pad, d_pad), const_map),         # w2 (logvar head)
                pl.BlockSpec((1, d_pad), const_map),             # b2 (logvar head)
            ],
            out_specs=pl.BlockSpec((8, d_pad), lambda s, t: (s, 0)),
        ),
        compiler_params=pltpu.CompilerParams(
            dimension_semantics=("parallel", "arbitrary"),
            vmem_limit_bytes=48 * 1024 * 1024,
        ),
        cost_estimate=cost,
    )(xb, yp, w1, b1, w2m_b, b2m_f, w2v_b, b2v_f)

    # ---- finalize in XLA (tiny, O(D)) -------------------------------------------
    acc = acc.reshape(num_splits, 8, d_pad).sum(axis=0)[:, :d]
    a_vec, b_vec, q_vec, dv_vec, lv_vec = (acc[i] for i in range(5))

    if pad_rows > 0:
        # Analytic contribution of one zero-padded row (x = 0, y = 0), mirroring
        # the kernel's bf16 pipeline; subtract it pad_rows times.
        h_row = jnp.maximum(b1, 0.0).astype(jnp.bfloat16)            # [1, 2*Hp]
        mu_p = (jnp.dot(h_row[:, :h_pad], w2m_b,
                        preferred_element_type=jnp.float32) + b2m_f)[0, :d]
        lv_p = jnp.tanh(jnp.dot(h_row[:, h_pad:], w2v_b,
                                preferred_element_type=jnp.float32) + b2v_f)[0, :d]
        iv_p = jnp.exp(-lv_p)
        k = jnp.asarray(pad_rows, jnp.float32)
        a_vec = a_vec - k * iv_p
        b_vec = b_vec - k * iv_p * mu_p
        q_vec = q_vec - k * iv_p * mu_p * mu_p
        dv_vec = dv_vec - k * iv_p * mu_p * mu_p      # y = 0 => dv = mu^2 * inv_var
        lv_vec = lv_vec - k * lv_p

    n_f = jnp.asarray(n, jnp.float32)
    y_mean = jnp.sum(yf, axis=0) / n_f
    y2_mean = jnp.sum(yf * yf, axis=0) / n_f
    lld = jnp.sum(-dv_vec - lv_vec) / n_f
    c_vec = q_vec - dv_vec                            # sum inv_var*mu^2 - sum dv
    upper_bound = 0.5 / n_f * jnp.sum(y2_mean * a_vec - 2.0 * y_mean * b_vec + c_vec)
    return lld, upper_bound


def club_reference(x, y, params):
    """Pure-JAX f32 reference matching the PyTorch module exactly."""
    (w1m, b1m, w2m, b2m, w1v, b1v, w2v, b2v) = [p.astype(jnp.float32) for p in params]
    xf = x.astype(jnp.float32)
    yf = y.astype(jnp.float32)
    mu = jnp.maximum(xf @ w1m + b1m, 0.0) @ w2m + b2m
    logvar = jnp.tanh(jnp.maximum(xf @ w1v + b1v, 0.0) @ w2v + b2v)
    var = jnp.exp(logvar)
    positive = -((mu - yf) ** 2) / 2.0 / var
    negative = -jnp.mean((yf[None, :, :] - mu[:, None, :]) ** 2, axis=1) / 2.0 / var
    upper_bound = jnp.mean(jnp.sum(positive, -1) - jnp.sum(negative, -1))
    lld = jnp.mean(jnp.sum(-((mu - yf) ** 2) / var - logvar, axis=1))
    return lld, upper_bound


def club_reference_kernel_precision(x, y, params):
    """f32 reference with the same bf16 rounding points as the Pallas kernel."""
    (w1m, b1m, w2m, b2m, w1v, b1v, w2v, b2v) = params
    bf = lambda a: a.astype(jnp.bfloat16).astype(jnp.float32)
    xb = bf(x)
    yf = y.astype(jnp.float32)
    h_mu = bf(jnp.maximum(xb @ bf(w1m) + b1m.astype(jnp.float32), 0.0))
    h_lv = bf(jnp.maximum(xb @ bf(w1v) + b1v.astype(jnp.float32), 0.0))
    mu = h_mu @ bf(w2m) + b2m.astype(jnp.float32)
    logvar = jnp.tanh(h_lv @ bf(w2v) + b2v.astype(jnp.float32))
    var = jnp.exp(logvar)
    positive = -((mu - yf) ** 2) / 2.0 / var
    negative = -jnp.mean((yf[None, :, :] - mu[:, None, :]) ** 2, axis=1) / 2.0 / var
    upper_bound = jnp.mean(jnp.sum(positive, -1) - jnp.sum(negative, -1))
    lld = jnp.mean(jnp.sum(-((mu - yf) ** 2) / var - logvar, axis=1))
    return lld, upper_bound


def init_params(key, emb_dim):
    """Deterministic synthetic parameters. Weights stored as [in, out]."""
    hidden = emb_dim // 2
    keys = jax.random.split(key, 8)
    scale1 = 1.0 / jnp.sqrt(emb_dim)
    scale2 = 1.0 / jnp.sqrt(hidden)
    w1m = jax.random.normal(keys[0], (emb_dim, hidden), jnp.float32) * scale1
    b1m = jax.random.normal(keys[1], (1, hidden), jnp.float32) * 0.1
    w2m = jax.random.normal(keys[2], (hidden, emb_dim), jnp.float32) * scale2
    b2m = jax.random.normal(keys[3], (1, emb_dim), jnp.float32) * 0.1
    w1v = jax.random.normal(keys[4], (emb_dim, hidden), jnp.float32) * scale1
    b1v = jax.random.normal(keys[5], (1, hidden), jnp.float32) * 0.1
    w2v = jax.random.normal(keys[6], (hidden, emb_dim), jnp.float32) * scale2
    b2v = jax.random.normal(keys[7], (1, emb_dim), jnp.float32) * 0.1
    return (w1m, b1m, w2m, b2m, w1v, b1v, w2v, b2v)


if __name__ == "__main__":
    N = 12         # not a multiple of 8 -> exercises the pad-row correction path
    EMB = 32       # emb_dim (module default is 300; small here), hidden = 16

    key = jax.random.PRNGKey(0)
    kx, ky, kp = jax.random.split(key, 3)
    x_samples = jax.random.normal(kx, (N, EMB), jnp.float32)
    y_samples = jax.random.normal(ky, (N, EMB), jnp.float32)
    params = init_params(kp, EMB)

    club_fn = jax.jit(club_forward, static_argnames=("tile_n", "num_splits"))
    lld, upper_bound = club_fn(x_samples, y_samples, params)
    jax.block_until_ready((lld, upper_bound))

    # Tight check vs. a reference that mimics the kernel's bf16 rounding points.
    lld_ref, ub_ref = club_reference_kernel_precision(x_samples, y_samples, params)
    # Loose sanity check vs. the exact-f32 module semantics.
    lld_f32, ub_f32 = club_reference(x_samples, y_samples, params)

    def _close(a, b, atol, rtol):
        return abs(float(a) - float(b)) <= atol + rtol * abs(float(b))

    assert _close(lld, lld_ref, 3e-2, 3e-3), (float(lld), float(lld_ref))
    assert _close(upper_bound, ub_ref, 3e-2, 3e-3), (float(upper_bound), float(ub_ref))
    assert _close(lld, lld_f32, 1.0, 1e-1), (float(lld), float(lld_f32))
    assert _close(upper_bound, ub_f32, 1.0, 1e-1), (float(upper_bound), float(ub_f32))

    print("KERNEL_OK")
</pallas_src>

<mosaic_0001>
module attributes {stable_mosaic.version = 11 : i64} {
  func.func @kernel(%arg0: i32, %arg1: i32, %arg2: memref<16x128xbf16, #tpu.memory_space<vmem>>, %arg3: memref<16x128xf32, #tpu.memory_space<vmem>>, %arg4: memref<128x256xbf16, #tpu.memory_space<vmem>>, %arg5: memref<1x256xf32, #tpu.memory_space<vmem>>, %arg6: memref<128x128xbf16, #tpu.memory_space<vmem>>, %arg7: memref<1x128xf32, #tpu.memory_space<vmem>>, %arg8: memref<128x128xbf16, #tpu.memory_space<vmem>>, %arg9: memref<1x128xf32, #tpu.memory_space<vmem>>, %arg10: memref<8x128xf32, #tpu.memory_space<vmem>>) attributes {dimension_semantics = [#tpu.dimension_semantics<parallel>, #tpu.dimension_semantics<arbitrary>], iteration_bounds = array<i64: 1, 1>, scalar_prefetch = 0 : i64, scratch_operands = 0 : i64, tpu.core_type = #tpu.core_type<tc>, window_params = [{transform_indices = @transform_0, window_bounds = array<i64: 16, 128>}, {transform_indices = @transform_1, window_bounds = array<i64: 16, 128>}, {pipeline_mode = #tpu.pipeline_mode<synchronous>, transform_indices = @transform_2, window_bounds = array<i64: 128, 256>}, {pipeline_mode = #tpu.pipeline_mode<synchronous>, transform_indices = @transform_3, window_bounds = array<i64: 1, 256>}, {pipeline_mode = #tpu.pipeline_mode<synchronous>, transform_indices = @transform_4, window_bounds = array<i64: 128, 128>}, {pipeline_mode = #tpu.pipeline_mode<synchronous>, transform_indices = @transform_5, window_bounds = array<i64: 1, 128>}, {pipeline_mode = #tpu.pipeline_mode<synchronous>, transform_indices = @transform_6, window_bounds = array<i64: 128, 128>}, {pipeline_mode = #tpu.pipeline_mode<synchronous>, transform_indices = @transform_7, window_bounds = array<i64: 1, 128>}, {transform_indices = @transform_8, window_bounds = array<i64: 8, 128>}]} {
    %c0_i32 = arith.constant 0 : i32
    %0 = arith.cmpi eq, %arg1, %c0_i32 : i32
    %1 = arith.extui %0 : i1 to i32
    %c0_i32_0 = arith.constant 0 : i32
    %2 = arith.cmpi ne, %1, %c0_i32_0 : i32
    scf.if %2 {
      %cst_30 = arith.constant 0.000000e+00 : f32
      %49 = vector.broadcast %cst_30 : f32 to vector<8x128xf32>
      %c0_31 = arith.constant 0 : index
      %c0_32 = arith.constant 0 : index
      %50 = vector.load %arg10[%c0_31, %c0_32] : memref<8x128xf32, #tpu.memory_space<vmem>>, vector<8x128xf32>
      tpu.vector_store %arg10[%c0_31, %c0_32], %49 {strides = array<i32>} : memref<8x128xf32, #tpu.memory_space<vmem>>, vector<8x128xf32>,
    } else {
    }
    %c0 = arith.constant 0 : index
    %c0_1 = arith.constant 0 : index
    %3 = vector.load %arg2[%c0, %c0_1] : memref<16x128xbf16, #tpu.memory_space<vmem>>, vector<16x128xbf16>
    %c0_2 = arith.constant 0 : index
    %c0_3 = arith.constant 0 : index
    %4 = vector.load %arg3[%c0_2, %c0_3] : memref<16x128xf32, #tpu.memory_space<vmem>>, vector<16x128xf32>
    %c0_4 = arith.constant 0 : index
    %c0_5 = arith.constant 0 : index
    %5 = vector.load %arg4[%c0_4, %c0_5] : memref<128x256xbf16, #tpu.memory_space<vmem>>, vector<128x256xbf16>
    %cst = arith.constant dense<0.000000e+00> : vector<16x256xf32>
    %6 = tpu.matmul %3, %5, %cst {dimension_numbers = #tpu.dot_dimension_numbers<[1], [0], [0], [1], [0, 0, 1, 1], [], []>} : vector<16x128xbf16>, vector<128x256xbf16>, vector<16x256xf32> -> vector<16x256xf32>
    %c0_6 = arith.constant 0 : index
    %c0_7 = arith.constant 0 : index
    %7 = vector.load %arg5[%c0_6, %c0_7] : memref<1x256xf32, #tpu.memory_space<vmem>>, vector<1x256xf32>
    %8 = vector.broadcast %7 : vector<1x256xf32> to vector<16x256xf32>
    %9 = arith.addf %6, %8 : vector<16x256xf32>
    %cst_8 = arith.constant 0.000000e+00 : f32
    %10 = vector.broadcast %cst_8 : f32 to vector<16x256xf32>
    %11 = arith.maximumf %9, %10 : vector<16x256xf32>
    %12 = arith.truncf %11 : vector<16x256xf32> to vector<16x256xbf16>
    %13 = vector.extract_strided_slice %12 {offsets = [0, 0], sizes = [16, 128], strides = [1, 1]} : vector<16x256xbf16> to vector<16x128xbf16>
    %14 = vector.extract_strided_slice %12 {offsets = [0, 128], sizes = [16, 128], strides = [1, 1]} : vector<16x256xbf16> to vector<16x128xbf16>
    %c0_9 = arith.constant 0 : index
    %c0_10 = arith.constant 0 : index
    %15 = vector.load %arg6[%c0_9, %c0_10] : memref<128x128xbf16, #tpu.memory_space<vmem>>, vector<128x128xbf16>
    %cst_11 = arith.constant dense<0.000000e+00> : vector<16x128xf32>
    %16 = tpu.matmul %13, %15, %cst_11 {dimension_numbers = #tpu.dot_dimension_numbers<[1], [0], [0], [1], [0, 0, 1, 1], [], []>} : vector<16x128xbf16>, vector<128x128xbf16>, vector<16x128xf32> -> vector<16x128xf32>
    %c0_12 = arith.constant 0 : index
    %c0_13 = arith.constant 0 : index
    %17 = vector.load %arg7[%c0_12, %c0_13] : memref<1x128xf32, #tpu.memory_space<vmem>>, vector<1x128xf32>
    %18 = vector.broadcast %17 : vector<1x128xf32> to vector<16x128xf32>
    %19 = arith.addf %16, %18 : vector<16x128xf32>
    %c0_14 = arith.constant 0 : index
    %c0_15 = arith.constant 0 : index
    %20 = vector.load %arg8[%c0_14, %c0_15] : memref<128x128xbf16, #tpu.memory_space<vmem>>, vector<128x128xbf16>
    %cst_16 = arith.constant dense<0.000000e+00> : vector<16x128xf32>
    %21 = tpu.matmul %14, %20, %cst_16 {dimension_numbers = #tpu.dot_dimension_numbers<[1], [0], [0], [1], [0, 0, 1, 1], [], []>} : vector<16x128xbf16>, vector<128x128xbf16>, vector<16x128xf32> -> vector<16x128xf32>
    %c0_17 = arith.constant 0 : index
    %c0_18 = arith.constant 0 : index
    %22 = vector.load %arg9[%c0_17, %c0_18] : memref<1x128xf32, #tpu.memory_space<vmem>>, vector<1x128xf32>
    %23 = vector.broadcast %22 : vector<1x128xf32> to vector<16x128xf32>
    %24 = arith.addf %21, %23 : vector<16x128xf32>
    %25 = math.tanh %24 : vector<16x128xf32>
    %cst_19 = arith.constant 0.000000e+00 : f32
    %26 = vector.broadcast %cst_19 : f32 to vector<16x128xf32>
    %27 = arith.subf %26, %25 : vector<16x128xf32>
    %28 = math.exp %27 : vector<16x128xf32>
    %29 = arith.mulf %28, %19 : vector<16x128xf32>
    %30 = arith.subf %19, %4 : vector<16x128xf32>
    %31 = arith.mulf %30, %30 : vector<16x128xf32>
    %32 = arith.mulf %31, %28 : vector<16x128xf32>
    %cst_20 = arith.constant dense<0.000000e+00> : vector<128xf32>
    %33 = vector.multi_reduction <add>, %28, %cst_20 [0] : vector<16x128xf32> to vector<128xf32>
    %34 = vector.shape_cast %33 : vector<128xf32> to vector<1x128xf32>
    %cst_21 = arith.constant dense<0.000000e+00> : vector<128xf32>
    %35 = vector.multi_reduction <add>, %29, %cst_21 [0] : vector<16x128xf32> to vector<128xf32>
    %36 = vector.shape_cast %35 : vector<128xf32> to vector<1x128xf32>
    %37 = arith.mulf %29, %19 : vector<16x128xf32>
    %cst_22 = arith.constant dense<0.000000e+00> : vector<128xf32>
    %38 = vector.multi_reduction <add>, %37, %cst_22 [0] : vector<16x128xf32> to vector<128xf32>
    %39 = vector.shape_cast %38 : vector<128xf32> to vector<1x128xf32>
    %cst_23 = arith.constant dense<0.000000e+00> : vector<128xf32>
    %40 = vector.multi_reduction <add>, %32, %cst_23 [0] : vector<16x128xf32> to vector<128xf32>
    %41 = vector.shape_cast %40 : vector<128xf32> to vector<1x128xf32>
    %cst_24 = arith.constant dense<0.000000e+00> : vector<128xf32>
    %42 = vector.multi_reduction <add>, %25, %cst_24 [0] : vector<16x128xf32> to vector<128xf32>
    %43 = vector.shape_cast %42 : vector<128xf32> to vector<1x128xf32>
    %cst_25 = arith.constant 0.000000e+00 : f32
    %44 = vector.broadcast %cst_25 : f32 to vector<3x128xf32>
    %45 = tpu.concatenate %34, %36, %39, %41, %43, %44 in 0 : vector<1x128xf32>, vector<1x128xf32>, vector<1x128xf32>, vector<1x128xf32>, vector<1x128xf32>, vector<3x128xf32> -> vector<8x128xf32>
    %c0_26 = arith.constant 0 : index
    %c0_27 = arith.constant 0 : index
    %46 = vector.load %arg10[%c0_26, %c0_27] : memref<8x128xf32, #tpu.memory_space<vmem>>, vector<8x128xf32>
    %47 = arith.addf %46, %45 : vector<8x128xf32>
    %c0_28 = arith.constant 0 : index
    %c0_29 = arith.constant 0 : index
    %48 = vector.load %arg10[%c0_28, %c0_29] : memref<8x128xf32, #tpu.memory_space<vmem>>, vector<8x128xf32>
    tpu.vector_store %arg10[%c0_28, %c0_29], %47 {strides = array<i32>} : memref<8x128xf32, #tpu.memory_space<vmem>>, vector<8x128xf32>,
    return
  }
  func.func @transform_0(%arg0: i32, %arg1: i32) -> (i32, i32) {
    %c1_i32 = arith.constant 1 : i32
    %0 = arith.muli %arg0, %c1_i32 : i32
    %1 = arith.addi %0, %arg1 : i32
    %c0_i32 = arith.constant 0 : i32
    %c0_i32_0 = arith.constant 0 : i32
    return %1, %c0_i32 : i32, i32
  }
  func.func @transform_1(%arg0: i32, %arg1: i32) -> (i32, i32) {
    %c1_i32 = arith.constant 1 : i32
    %0 = arith.muli %arg0, %c1_i32 : i32
    %1 = arith.addi %0, %arg1 : i32
    %c0_i32 = arith.constant 0 : i32
    %c0_i32_0 = arith.constant 0 : i32
    return %1, %c0_i32 : i32, i32
  }
  func.func @transform_2(%arg0: i32, %arg1: i32) -> (i32, i32) {
    %c0_i32 = arith.constant 0 : i32
    %c0_i32_0 = arith.constant 0 : i32
    %c0_i32_1 = arith.constant 0 : i32
    return %c0_i32, %c0_i32_0 : i32, i32
  }
  func.func @transform_3(%arg0: i32, %arg1: i32) -> (i32, i32) {
    %c0_i32 = arith.constant 0 : i32
    %c0_i32_0 = arith.constant 0 : i32
    %c0_i32_1 = arith.constant 0 : i32
    return %c0_i32, %c0_i32_0 : i32, i32
  }
  func.func @transform_4(%arg0: i32, %arg1: i32) -> (i32, i32) {
    %c0_i32 = arith.constant 0 : i32
    %c0_i32_0 = arith.constant 0 : i32
    %c0_i32_1 = arith.constant 0 : i32
    return %c0_i32, %c0_i32_0 : i32, i32
  }
  func.func @transform_5(%arg0: i32, %arg1: i32) -> (i32, i32) {
    %c0_i32 = arith.constant 0 : i32
    %c0_i32_0 = arith.constant 0 : i32
    %c0_i32_1 = arith.constant 0 : i32
    return %c0_i32, %c0_i32_0 : i32, i32
  }
  func.func @transform_6(%arg0: i32, %arg1: i32) -> (i32, i32) {
    %c0_i32 = arith.constant 0 : i32
    %c0_i32_0 = arith.constant 0 : i32
    %c0_i32_1 = arith.constant 0 : i32
    return %c0_i32, %c0_i32_0 : i32, i32
  }
  func.func @transform_7(%arg0: i32, %arg1: i32) -> (i32, i32) {
    %c0_i32 = arith.constant 0 : i32
    %c0_i32_0 = arith.constant 0 : i32
    %c0_i32_1 = arith.constant 0 : i32
    return %c0_i32, %c0_i32_0 : i32, i32
  }
  func.func @transform_8(%arg0: i32, %arg1: i32) -> (i32, i32) {
    %c0_i32 = arith.constant 0 : i32
    %c0_i32_0 = arith.constant 0 : i32
    return %arg0, %c0_i32 : i32, i32
  }
}

</mosaic_0001>

<bundles_post_ra>
// kernel: club_forward.1
= control target key start
LH: loop header
LB: loop body
LE: loop exit
PB: predicated region body
PF: predicated region fallthrough
CT: control target
= control target key end

     0   :  { %vm451_vm0 = vcmask 1040384   ;;  %vm453_vm1 = vcmask 1041408   ;;  %vm455_vm2 = vcmask 1042432   ;;  %vm457_vm3 = vcmask 1043456   ;;  %s866_s2 = inlined_call_operand.vmem [shape: bf16[128,256], index: 2, kind: input, shape index: {}]   ;;  %s867_s4 = inlined_call_operand.vmem [shape: bf16[128,128], index: 4, kind: input, shape index: {}]   ;;  %s868_s6 = inlined_call_operand.vmem [shape: bf16[128,128], index: 6, kind: input, shape index: {}]   ;;  %s869_s0 = inlined_call_operand.vmem [shape: bf16[16,128], index: 0, kind: input, shape index: {}]   ;;  %s870_s5 = inlined_call_operand.vmem [shape: f32[1,128], index: 5, kind: input, shape index: {}]   ;;  %s871_s3 = inlined_call_operand.vmem [shape: f32[1,256], index: 3, kind: input, shape index: {}]   ;;  %s872_s7 = inlined_call_operand.vmem [shape: f32[1,128], index: 7, kind: input, shape index: {}]   ;;  %s873_s1 = inlined_call_operand.vmem [shape: f32[16,128], index: 1, kind: input, shape index: {}]   ;;  %s874_s8 = inlined_call_operand.vmem [shape: f32[8,128], index: 8, kind: output, shape index: {}]  }
   0x1   :  { %v542_v0 = vld [vmem:[%s866_s2 + $0x70] sm:$0xf]  ;;  %v628_v1 = vld [vmem:[%s866_s2 + $0x74] sm:$0xf0]  ;;  %v627_v2 = vld [vmem:[%s866_s2 + $0x74] sm:$0xf] }
   0x2   :  { %v543_v3 = vor.u32 %v628_v1, %v542_v0  ;;  %v544_v4 = vld [vmem:[%s866_s2 + $0x78] sm:$0xf0]  ;;  %v534_v5 = vld [vmem:[%s866_s2 + $0x60] sm:$0xf]  ;;  %v626_v6 = vld [vmem:[%s866_s2 + $0x64] sm:$0xf0] }
   0x3   :  { %v547_v7 = vor.u32 %v627_v2, %v544_v4  ;;  %v625_v8 = vld [vmem:[%s866_s2 + $0x64] sm:$0xf]  ;;  %v536_v9 = vld [vmem:[%s866_s2 + $0x68] sm:$0xf0]  ;;  %v535_v10 = vor.u32 %v626_v6, %v534_v5  ;;  %v526_v12 = vld [vmem:[%s866_s2 + $0x50] sm:$0xf] }
   0x4   :  { %190 = vmatpush.bf16.msra.mxu0 %v543_v3  ;;  %v539_v11 = vor.u32 %v625_v8, %v536_v9  ;;  %v624_v13 = vld [vmem:[%s866_s2 + $0x54] sm:$0xf0]  ;;  %v623_v14 = vld [vmem:[%s866_s2 + $0x54] sm:$0xf]  ;;  %v528_v15 = vld [vmem:[%s866_s2 + $0x58] sm:$0xf0] }
   0x5   :  { %204 = vmatpush.bf16.msra.mxu1 %v547_v7  ;;  %v527_v16 = vor.u32 %v624_v13, %v526_v12  ;;  %v531_v17 = vor.u32 %v623_v14, %v528_v15  ;;  %v518_v18 = vld [vmem:[%s866_s2 + $0x40] sm:$0xf]  ;;  %v622_v19 = vld [vmem:[%s866_s2 + $0x44] sm:$0xf0]  ;;  %v621_v20 = vld [vmem:[%s866_s2 + $0x44] sm:$0xf] }
   0x6   :  { %v520_v21 = vld [vmem:[%s866_s2 + $0x48] sm:$0xf0]  ;;  %v519_v22 = vor.u32 %v622_v19, %v518_v18  ;;  %v636_v23 = vld [vmem:[%s867_s4 + $0x38] sm:$0xff]  ;;  %v510_v26 = vld [vmem:[%s866_s2 + $0x30] sm:$0xf]  ;;  %vm459_vm4 = vcmask 1044480  }
   0x7   :  { %v644_v24 = vld [vmem:[%s868_s6 + $0x38] sm:$0xff]  ;;  %v523_v25 = vor.u32 %v621_v20, %v520_v21  ;;  %v619_v28 = vld [vmem:[%s866_s2 + $0x34] sm:$0xf]  ;;  %298 = vmatpush.bf16.msra.mxu2 %v636_v23  ;;  %v502_v34 = vld [vmem:[%s866_s2 + $0x20] sm:$0xf] }
   0x8   :  { %191 = vmatpush.bf16.msra.mxu0 %v535_v10  ;;  %v620_v27 = vld [vmem:[%s866_s2 + $0x34] sm:$0xf0]  ;;  %v512_v29 = vld [vmem:[%s866_s2 + $0x38] sm:$0xf0]  ;;  %384 = vmatpush.bf16.msra.mxu3 %v644_v24  ;;  %v635_v30 = vld [vmem:[%s867_s4 + $0x30] sm:$0xff] }
   0x9   :  { %205 = vmatpush.bf16.msra.mxu1 %v539_v11  ;;  %v643_v31 = vld [vmem:[%s868_s6 + $0x30] sm:$0xff]  ;;  %v511_v32 = vor.u32 %v620_v27, %v510_v26  ;;  %v515_v33 = vor.u32 %v619_v28, %v512_v29  ;;  %v618_v35 = vld [vmem:[%s866_s2 + $0x24] sm:$0xf0]  ;;  %v617_v36 = vld [vmem:[%s866_s2 + $0x24] sm:$0xf] }
   0xa   :  { %v504_v37 = vld [vmem:[%s866_s2 + $0x28] sm:$0xf0]  ;;  %v503_v40 = vor.u32 %v618_v35, %v502_v34  ;;  %v494_v42 = vld [vmem:[%s866_s2 + $0x10] sm:$0xf]  ;;  %v616_v43 = vld [vmem:[%s866_s2 + $0x14] sm:$0xf0] }
   0xb   :  { %299 = vmatpush.bf16.msra.mxu2 %v635_v30  ;;  %v634_v38 = vld [vmem:[%s867_s4 + $0x28] sm:$0xff]  ;;  %v507_v41 = vor.u32 %v617_v36, %v504_v37  ;;  %v615_v44 = vld [vmem:[%s866_s2 + $0x14] sm:$0xf]  ;;  %v496_v45 = vld [vmem:[%s866_s2 + $0x18] sm:$0xf0]  ;;  %v495_v46 = vor.u32 %v616_v43, %v494_v42 }
   0xc   :  { %192 = vmatpush.bf16.msra.mxu0 %v527_v16  ;;  %385 = vmatpush.bf16.msra.mxu3 %v643_v31  ;;  %v642_v39 = vld [vmem:[%s868_s6 + $0x28] sm:$0xff]  ;;  %v499_v47 = vor.u32 %v615_v44, %v496_v45  ;;  %v486_v48 = vld [vmem:[%s866_s2] sm:$0xf]  ;;  %v613_v50 = vld [vmem:[%s866_s2 + $0x4] sm:$0xf] }
   0xd   :  { %206 = vmatpush.bf16.msra.mxu1 %v531_v17  ;;  %v614_v49 = vld [vmem:[%s866_s2 + $0x4] sm:$0xf0]  ;;  %v488_v51 = vld [vmem:[%s866_s2 + $0x8] sm:$0xf0]  ;;  %v612_v54 = vld [vmem:[%s869_s0] sm:$0xff] }
   0xe   :  { %v487_v52 = vor.u32 %v614_v49, %v486_v48  ;;  %v491_v53 = vor.u32 %v613_v50, %v488_v51  ;;  %v633_v55 = vld [vmem:[%s867_s4 + $0x20] sm:$0xff]  ;;  %v632_v57 = vld [vmem:[%s867_s4 + $0x18] sm:$0xff]  ;;  %v631_v59 = vld [vmem:[%s867_s4 + $0x10] sm:$0xff] }
   0xf   :  { %300 = vmatpush.bf16.msra.mxu2 %v634_v38  ;;  %v641_v56 = vld [vmem:[%s868_s6 + $0x20] sm:$0xff]  ;;  %v640_v58 = vld [vmem:[%s868_s6 + $0x18] sm:$0xff]  ;;  %v639_v60 = vld [vmem:[%s868_s6 + $0x10] sm:$0xff] }
  0x10   :  { %193 = vmatpush.bf16.msra.mxu0 %v519_v22  ;;  %386 = vmatpush.bf16.msra.mxu3 %v642_v39  ;;  %v630_v61 = vld [vmem:[%s867_s4 + $0x8] sm:$0xff]  ;;  %v629_v63 = vld [vmem:[%s867_s4] sm:$0xff] }
  0x11   :  { %207 = vmatpush.bf16.msra.mxu1 %v523_v25  ;;  %v638_v62 = vld [vmem:[%s868_s6 + $0x8] sm:$0xff]  ;;  %v637_v0 = vld [vmem:[%s868_s6] sm:$0xff] }
  0x12   :  { %v98_v1 = vld [vmem:[%s871_s3] sm:$0x3] }
  0x13   :  { %301 = vmatpush.bf16.msra.mxu2 %v633_v55  ;;  %v100_v2 = vperm.slane %v98_v1, 0  ;;  %v101_v4 = vperm.slane %v98_v1, 1  ;;  %v647_v24 = vld [vmem:[%s872_s7] ss:$0 sm:$0xff] }
  0x14   :  { %194 = vmatpush.bf16.msra.mxu0 %v511_v32  ;;  %387 = vmatpush.bf16.msra.mxu3 %v641_v56  ;;  %v80_v39 = vld [vmem:[%s873_s1] sm:$0xff] }
  0x15   :  { %208 = vmatpush.bf16.msra.mxu1 %v515_v33  ;;  %v646_v33 = vld [vmem:[%s870_s5] ss:$0 sm:$0xff] }
  0x17   :  { %302 = vmatpush.bf16.msra.mxu2 %v632_v57 }
  0x18   :  { %195 = vmatpush.bf16.msra.mxu0 %v503_v40  ;;  %388 = vmatpush.bf16.msra.mxu3 %v640_v58  ;;  %v81_v40 = vld [vmem:[%s873_s1 + $0x8] sm:$0xff] }
  0x19   :  { %209 = vmatpush.bf16.msra.mxu1 %v507_v41 }
  0x1b   :  { %303 = vmatpush.bf16.msra.mxu2 %v631_v59 }
  0x1c   :  { %196 = vmatpush.bf16.msra.mxu0 %v495_v46  ;;  %389 = vmatpush.bf16.msra.mxu3 %v639_v60 }
  0x1d   :  { %210 = vmatpush.bf16.msra.mxu1 %v499_v47 }
  0x1f   :  { %304 = vmatpush.bf16.msra.mxu2 %v630_v61 }
  0x20   :  { %197 = vmatpush.bf16.msra.mxu0 %v487_v52  ;;  %390 = vmatpush.bf16.msra.mxu3 %v638_v62 }
  0x21   :  { %211 = vmatpush.bf16.msra.mxu1 %v491_v53 }
  0x23   :  { %198 = vmatmul.bf16.vlgmr.msra.gmra.mxu0 %v612_v54  ;;  %305 = vmatpush.bf16.msra.mxu2 %v629_v63 }
  0x24   :  { %212 = vmatmul.bf16.vlgmr.msra.gmra.mxu1 %v612_v54  ;;  %391 = vmatpush.bf16.msra.mxu3 %v637_v0 }
  0xa0   :  { %v199_v3 = vpop.f32.mrf.mxu0 }
  0xa1   :  { %v213_v5 = vpop.f32.mrf.mxu1  ;;  %v200_v6 = vadd.f32 %v199_v3, %v100_v2 }
  0xa2   :  { %v214_v7 = vadd.f32 %v213_v5, %v101_v4 }
  0xa3   :  { %v218_v8 = vmax.f32 %v200_v6, 0.0 }
  0xa4   :  { %v219_v9 = vmax.f32 %v214_v7, 0.0 }
  0xa6   :  { %v222_v15 = vpack.c.bf16 %v219_v9, %v218_v8 }
  0xa8   :  { %v201_v10 = vpop.f32.mrf.mxu0  ;;  %v246_v18 = vunpack.c.l.b16 %v222_v15  ;;  %v332_v20 = vunpack.c.h.b16 %v222_v15 }
  0xa9   :  { %v202_v11 = vadd.f32 %v201_v10, %v100_v2  ;;  %v215_v12 = vpop.f32.mrf.mxu1 }
  0xaa   :  { %v216_v13 = vadd.f32 %v215_v12, %v101_v4 }
  0xab   :  { %v220_v14 = vmax.f32 %v202_v11, 0.0 }
  0xac   :  { %v221_v16 = vmax.f32 %v216_v13, 0.0 }
  0xae   :  { %v223_v17 = vpack.c.bf16 %v221_v16, %v220_v14 }
  0xb0   :  { %v247_v19 = vunpack.c.l.b16 %v223_v17  ;;  %v333_v21 = vunpack.c.h.b16 %v223_v17 }
  0xb2   :  { %v248_v22 = vpack.c.b16 %v247_v19, %v246_v18  ;;  %v334_v23 = vpack.c.b16 %v333_v21, %v332_v20 }
  0xb4   :  { %306 = vmatmul.bf16.vlgmr.msra.gmra.mxu2 %v248_v22  ;;  %392 = vmatmul.bf16.vlgmr.msra.gmra.mxu3 %v334_v23 }
 0x137   :  { %v393_v25 = vpop.f32.mrf.mxu3  ;;  %v307_v27 = vpop.f32.mrf.mxu2 }
 0x138   :  { %v394_v26 = vadd.f32 %v647_v24, %v393_v25  ;;  %v308_v37 = vadd.f32 %v646_v33, %v307_v27 }
 0x13a   :  { %648 = vtanh.f32 %v394_v26  ;;  %v408_v44 = vsub.f32 %v308_v37, %v80_v39 }
 0x13c   :  { %v410_v48 = vmul.f32 %v408_v44, %v408_v44 }
 0x13f   :  { %v395_v28 = vpop.f32.mrf.mxu3  ;;  %v309_v34 = vpop.f32.mrf.mxu2 }
 0x140   :  { %v649_v29 = vpop.eup %648  ;;  %v396_v30 = vadd.f32 %v647_v24, %v395_v28  ;;  %v310_v38 = vadd.f32 %v646_v33, %v309_v34 }
 0x141   :  { %v400_v31 = vsub.f32 0.0, %v649_v29 }
 0x142   :  { %650 = vtanh.f32 %v396_v30  ;;  %v409_v45 = vsub.f32 %v310_v38, %v81_v40 }
 0x143   :  { %v402_v32 = vmul.f32 1.442695, %v400_v31 }
 0x144   :  { %v411_v49 = vmul.f32 %v409_v45, %v409_v45 }
 0x145   :  { %652 = vpow2.f32 %v402_v32 }
 0x148   :  { %v651_v35 = vpop.eup %650 }
 0x149   :  { %v401_v36 = vsub.f32 0.0, %v651_v35  ;;  %v444_v42 = vadd.f32 %v651_v35, %v649_v29 }
 0x14b   :  { %v404_v41 = vmul.f32 1.442695, %v401_v36  ;;  %v653_v43 = vpop.eup %652  ;;  %v445_v47 = vrot.slane %v444_v42, 4 }
 0x14c   :  { %v406_v46 = vmul.f32 %v653_v43, %v308_v37  ;;  %v412_v51 = vmul.f32 %v653_v43, %v410_v48 }
 0x14d   :  { %654 = vpow2.f32 %v404_v41  ;;  %v446_v56 = vadd.f32 %v445_v47, %v444_v42 }
 0x14e   :  { %v428_v55 = vmul.f32 %v406_v46, %v308_v37 }
 0x14f   :  { %v447_v1 = vrot.slane %v446_v56, 2 }
 0x151   :  { %v448_v10 = vadd.f32 %v447_v1, %v446_v56 }
 0x153   :  { %v655_v50 = vpop.eup %654  ;;  %v449_v21 = vrot.slane %v448_v10, 1 }
 0x154   :  { %v407_v52 = vmul.f32 %v655_v50, %v310_v38  ;;  %v413_v53 = vmul.f32 %v655_v50, %v411_v49  ;;  %v414_v54 = vadd.f32 %v655_v50, %v653_v43 }
 0x155   :  { %v450_v25 = vadd.f32 %v449_v21, %v448_v10 }
 0x156   :  { %v415_v57 = vrot.slane %v414_v54, 4  ;;  %v421_v58 = vadd.f32 %v407_v52, %v406_v46  ;;  %v429_v59 = vmul.f32 %v407_v52, %v310_v38  ;;  %v437_v60 = vadd.f32 %v413_v53, %v412_v51 }
 0x158   :  { %v416_v61 = vadd.f32 %v415_v57, %v414_v54  ;;  %v422_v62 = vrot.slane %v421_v58, 4  ;;  %v430_v63 = vadd.f32 %v429_v59, %v428_v55  ;;  %v438_v0 = vrot.slane %v437_v60, 4 }
 0x15a   :  { %v417_v2 = vrot.slane %v416_v61, 2  ;;  %v423_v3 = vadd.f32 %v422_v62, %v421_v58  ;;  %v431_v4 = vrot.slane %v430_v63, 4  ;;  %v439_v5 = vadd.f32 %v438_v0, %v437_v60 }
 0x15c   :  { %v418_v6 = vadd.f32 %v417_v2, %v416_v61  ;;  %v424_v7 = vrot.slane %v423_v3, 2  ;;  %v432_v8 = vadd.f32 %v431_v4, %v430_v63  ;;  %v440_v9 = vrot.slane %v439_v5, 2 }
 0x15e   :  { %v419_v11 = vrot.slane %v418_v6, 1  ;;  %v425_v12 = vadd.f32 %v424_v7, %v423_v3  ;;  %v433_v13 = vrot.slane %v432_v8, 2  ;;  %v441_v14 = vadd.f32 %v440_v9, %v439_v5 }
 0x160   :  { %v426_v15 = vrot.slane %v425_v12, 1  ;;  %v434_v16 = vadd.f32 %v433_v13, %v432_v8  ;;  %v442_v17 = vrot.slane %v441_v14, 1  ;;  %v420_v18 = vadd.f32 %v419_v11, %v418_v6 }
 0x162   :  { %v427_v19 = vadd.f32 %v426_v15, %v425_v12  ;;  %v435_v20 = vrot.slane %v434_v16, 1  ;;  %v443_v24 = vadd.f32 %v442_v17, %v441_v14 }
 0x164   :  { %v436_v22 = vadd.f32 %v435_v20, %v434_v16  ;;  %v452_v23 = vsel %vm451_vm0, %v420_v18, %v427_v19 }
 0x166   :  { %v454_v26 = vsel %vm453_vm1, %v452_v23, %v436_v22 }
 0x167   :  { %v456_v27 = vsel %vm455_vm2, %v454_v26, %v443_v24 }
 0x168   :  { %v458_v28 = vsel %vm457_vm3, %v456_v27, %v450_v25 }
 0x169   :  { %v460_v29 = vsel %vm459_vm4, %v458_v28, 0.0 }
 0x16a   :  { %463 = vst [vmem:[%s874_s8] sm:$0xff] %v460_v29 }

</bundles_post_ra>
